<compile_context>
chip_gen: v7x
topology: tpu7x:2x2x1
jax: 0.10.0
libtpu: 0.0.40
codegen_flags: <defaults>
</compile_context>

<pallas_src>
import functools

import jax
import jax.numpy as jnp
from jax.experimental import pallas as pl
from jax.experimental.pallas import tpu as pltpu


def _round_up(x, m):
    return (x + m - 1) // m * m


# ----------------------------------------------------------------------------
# Pallas kernel 1: vocab-tiled  z = x @ W + b  with online logsumexp
# ----------------------------------------------------------------------------
def _linear_lse_kernel(x_ref, w_ref, b_ref, z_ref, lse_ref, m_sc, l_sc):
    # x_ref: [tm, H] bf16   w_ref: [H, tn] bf16   b_ref: [1, tn] f32
    # z_ref: [tm, tn] f32   lse_ref: [tm, 1] f32
    j = pl.program_id(1)

    @pl.when(j == 0)
    def _():
        m_sc[...] = jnp.full_like(m_sc, -jnp.inf)
        l_sc[...] = jnp.zeros_like(l_sc)

    z = jnp.dot(x_ref[...], w_ref[...],
                preferred_element_type=jnp.float32) + b_ref[...]
    z_ref[...] = z

    m_prev = m_sc[...]
    m_new = jnp.maximum(m_prev, jnp.max(z, axis=-1, keepdims=True))
    l_sc[...] = (l_sc[...] * jnp.exp(m_prev - m_new)
                 + jnp.sum(jnp.exp(z - m_new), axis=-1, keepdims=True))
    m_sc[...] = m_new

    @pl.when(j == pl.num_programs(1) - 1)
    def _():
        lse_ref[...] = m_sc[...] + jnp.log(l_sc[...])


# ----------------------------------------------------------------------------
# Pallas kernel 2: finalize  logprobs = z - lse   (elementwise, mem-bound)
# ----------------------------------------------------------------------------
def _finalize_kernel(z_ref, lse_ref, o_ref):
    o_ref[...] = z_ref[...] - lse_ref[...]


def linear_logsoftmax_pallas(x, w, b, *, tm_target=256, tn_target=2048):
    """log_softmax(x @ w + b, axis=-1).

    x: [M, H] float, w: [H, V] (stored bf16), b: [V] float -> [M, V] f32.
    Rows are padded to the row tile, vocab padded to a multiple of the vocab
    tile (padded vocab columns get a -1e30 bias so they vanish from the
    logsumexp); padding is sliced off on return.
    """
    M, H = x.shape
    V = w.shape[1]

    row_align = 16  # bf16 sublane packing
    tm = min(_round_up(tm_target, row_align), _round_up(M, row_align))
    Mp = _round_up(M, tm)
    tn = min(tn_target, _round_up(V, 128))
    Vp = _round_up(V, tn)

    x_p = jnp.pad(x.astype(jnp.bfloat16), ((0, Mp - M), (0, 0)))
    w_p = jnp.pad(w.astype(jnp.bfloat16), ((0, 0), (0, Vp - V)))
    b_p = jnp.pad(b.astype(jnp.float32).reshape(1, V),
                  ((0, 0), (0, Vp - V)), constant_values=-1e30)

    grid = (Mp // tm, Vp // tn)

    # Explicit VMEM budget (double-buffered tiles + headroom), clamped so it
    # fits every generation (v5e 16 MiB default .. v7x 64 MiB physical).
    est = (2 * tm * H * 2 + 2 * H * tn * 2 + 2 * tm * tn * 4
           + 2 * tn * 4 + 8 * tm * 4 + (2 << 20))
    vmem_limit = int(min(max(est, 16 << 20), 48 << 20))

    z_raw, lse = pl.pallas_call(
        _linear_lse_kernel,
        out_shape=(jax.ShapeDtypeStruct((Mp, Vp), jnp.float32),
                   jax.ShapeDtypeStruct((Mp, 1), jnp.float32)),
        grid_spec=pltpu.PrefetchScalarGridSpec(
            num_scalar_prefetch=0,
            grid=grid,
            in_specs=[
                pl.BlockSpec((tm, H), lambda i, j: (i, 0)),   # activations
                pl.BlockSpec((H, tn), lambda i, j: (0, j)),   # streamed weight
                pl.BlockSpec((1, tn), lambda i, j: (0, j)),   # streamed bias
            ],
            out_specs=[
                pl.BlockSpec((tm, tn), lambda i, j: (i, j)),  # raw logits
                pl.BlockSpec((tm, 1), lambda i, j: (i, 0)),   # logsumexp
            ],
            scratch_shapes=[pltpu.VMEM((tm, 1), jnp.float32),   # running max
                            pltpu.VMEM((tm, 1), jnp.float32)],  # running sum
        ),
        compiler_params=pltpu.CompilerParams(
            dimension_semantics=("parallel", "arbitrary"),
            vmem_limit_bytes=vmem_limit),
    )(x_p, w_p, b_p)

    out = pl.pallas_call(
        _finalize_kernel,
        out_shape=jax.ShapeDtypeStruct((Mp, Vp), jnp.float32),
        grid_spec=pltpu.PrefetchScalarGridSpec(
            num_scalar_prefetch=0,
            grid=grid,
            in_specs=[
                pl.BlockSpec((tm, tn), lambda i, j: (i, j)),
                pl.BlockSpec((tm, 1), lambda i, j: (i, 0)),
            ],
            out_specs=pl.BlockSpec((tm, tn), lambda i, j: (i, j)),
        ),
        input_output_aliases={0: 0},   # finalize in place, no extra HBM alloc
        compiler_params=pltpu.CompilerParams(
            dimension_semantics=("parallel", "parallel"),
            vmem_limit_bytes=vmem_limit),
    )(z_raw, lse)

    return out[:M, :V]


# ----------------------------------------------------------------------------
# Deterministic stand-in encoder (plain JAX glue).
# ----------------------------------------------------------------------------
def standin_encoder(params, seq, seq_mask, seq_lengths, f_t_all):
    tok_emb = params["tok_emb"][seq]                           # [B, L, H]
    vis_emb = jnp.einsum("bvd,dh->bvh", f_t_all,
                         params["vis_proj"])                   # [B, Vl, H]
    ctx = jnp.concatenate([vis_emb, tok_emb], axis=1)          # [B, Vl+L, H]
    return jnp.tanh(ctx)


# ----------------------------------------------------------------------------
# NLLLoss(ignore_index=0), mean over non-ignored targets (plain JAX).
# ----------------------------------------------------------------------------
def _nll_loss_ignore0(log_probs, targets):
    tgt = targets.astype(jnp.int32)
    ll = jnp.take_along_axis(log_probs, tgt[..., None], axis=-1)[..., 0]
    valid = (tgt != 0).astype(jnp.float32)
    return -(ll * valid).sum() / jnp.maximum(valid.sum(), 1.0)


# ----------------------------------------------------------------------------
# BertAddPreTrain.forward
# ----------------------------------------------------------------------------
def bert_add_pretrain_forward(params, seq, seq_mask, seq_lengths, labels,
                              isnext=None, f_t_all=None):
    ctx = standin_encoder(params, seq, seq_mask, seq_lengths, f_t_all)
    vision_len = f_t_all.shape[1] if f_t_all is not None else 0

    cls_part = ctx[:, vision_len, :]               # [B, H]
    lang_part = ctx[:, vision_len + 1:, :]         # [B, L-1, H]

    # NextImgPrediction head: tiny Linear(H, 2) + LogSoftmax -> leave to XLA
    # (2-wide output in Pallas would force masked stores for ~nothing).
    next_vision_output = jax.nn.log_softmax(
        cls_part.astype(jnp.float32) @ params["nv_w"] + params["nv_b"],
        axis=-1)

    # MaskedLanguageModel head: Linear(H, vocab) + LogSoftmax in Pallas.
    B, Lm1, H = lang_part.shape
    lang_flat = lang_part.reshape(B * Lm1, H)
    mlm_flat = linear_logsoftmax_pallas(lang_flat, params["mlm_w"],
                                        params["mlm_b"])
    mask_lm_output = mlm_flat.reshape(B, Lm1, -1)

    # Losses (NLLLoss with ignore_index=0, as in the reference module).
    mask_loss = _nll_loss_ignore0(mask_lm_output, labels[:, 1:])
    next_loss = 0.0
    if isnext is not None:
        next_loss = _nll_loss_ignore0(next_vision_output, isnext)
    loss = mask_loss + next_loss
    return next_vision_output, mask_lm_output, loss


# ----------------------------------------------------------------------------
# Parameter construction (deterministic, in-script)
# ----------------------------------------------------------------------------
def make_params(key, *, vision_size, hidden, vocab_size):
    ks = jax.random.split(key, 6)
    scale = 0.02
    return {
        # stand-in encoder params
        "tok_emb":  scale * jax.random.normal(ks[0], (vocab_size, hidden),
                                              jnp.float32),
        "vis_proj": scale * jax.random.normal(ks[1], (vision_size, hidden),
                                              jnp.float32),
        # NextImgPrediction: Linear(hidden, 2)   (stored as [H, 2], f32)
        "nv_w": scale * jax.random.normal(ks[2], (hidden, 2), jnp.float32),
        "nv_b": scale * jax.random.normal(ks[3], (2,), jnp.float32),
        # MaskedLanguageModel: Linear(hidden, vocab)  (stored as [H, V], bf16
        # so the dominant weight stream is half-width on HBM and the MXU).
        "mlm_w": (scale * jax.random.normal(ks[4], (hidden, vocab_size),
                                            jnp.float32)).astype(jnp.bfloat16),
        "mlm_b": scale * jax.random.normal(ks[5], (vocab_size,), jnp.float32),
    }


if __name__ == "__main__":
    B = 2
    seq_len = 8
    vision_len = 3
    vision_size = 16
    hidden = 32
    vocab_size = 128

    root = jax.random.PRNGKey(0)
    kp, kseq, kvis, klab = jax.random.split(root, 4)

    params = make_params(kp, vision_size=vision_size, hidden=hidden,
                         vocab_size=vocab_size)

    seq = jax.random.randint(kseq, (B, seq_len), 0, vocab_size, jnp.int32)
    seq_mask = jnp.zeros((B, seq_len), jnp.float32)
    seq_lengths = jnp.full((B,), seq_len, jnp.int32)
    f_t_all = jax.random.normal(kvis, (B, vision_len, vision_size),
                                jnp.float32)
    labels = jax.random.randint(klab, (B, seq_len), 0, vocab_size, jnp.int32)
    isnext = jnp.array([1, 0], jnp.int32)

    fwd = jax.jit(functools.partial(bert_add_pretrain_forward, params))
    next_vision_output, mask_lm_output, loss = fwd(
        seq, seq_mask, seq_lengths, labels, isnext=isnext, f_t_all=f_t_all)
    jax.block_until_ready((next_vision_output, mask_lm_output, loss))

    # --- sanity checks -------------------------------------------------------
    assert next_vision_output.shape == (B, 2)
    assert mask_lm_output.shape == (B, seq_len - 1, vocab_size)
    assert jnp.allclose(jnp.exp(next_vision_output).sum(-1), 1.0, atol=1e-4)
    assert jnp.allclose(jnp.exp(mask_lm_output).sum(-1), 1.0, atol=1e-4)
    assert bool(jnp.isfinite(loss))

    # pure-JAX reference for the MLM head (bf16 weight, f32 math)
    ctx_ref = standin_encoder(params, seq, seq_mask, seq_lengths, f_t_all)
    lang_ref = ctx_ref[:, vision_len + 1:, :].reshape(-1, hidden)
    ref_logits = (lang_ref @ params["mlm_w"].astype(jnp.float32)
                  + params["mlm_b"])
    ref = jax.nn.log_softmax(ref_logits, axis=-1).reshape(
        B, seq_len - 1, vocab_size)
    assert jnp.allclose(mask_lm_output, ref, atol=5e-2, rtol=5e-2)

    print("KERNEL_OK")
</pallas_src>

<mosaic_0001>
module attributes {stable_mosaic.version = 11 : i64} {
  func.func @_finalize_kernel(%arg0: i32, %arg1: i32, %arg2: memref<16x128xf32, #tpu.memory_space<vmem>>, %arg3: memref<16x1xf32, #tpu.memory_space<vmem>>, %arg4: memref<16x128xf32, #tpu.memory_space<vmem>>) attributes {dimension_semantics = [#tpu.dimension_semantics<parallel>, #tpu.dimension_semantics<parallel>], iteration_bounds = array<i64: 1, 1>, scalar_prefetch = 0 : i64, scratch_operands = 0 : i64, tpu.core_type = #tpu.core_type<tc>, window_params = [{transform_indices = @transform_0, window_bounds = array<i64: 16, 128>}, {transform_indices = @transform_1, window_bounds = array<i64: 16, 1>}, {transform_indices = @transform_2, window_bounds = array<i64: 16, 128>}]} {
    %c0 = arith.constant 0 : index
    %c0_0 = arith.constant 0 : index
    %0 = vector.load %arg2[%c0, %c0_0] : memref<16x128xf32, #tpu.memory_space<vmem>>, vector<16x128xf32>
    %c0_1 = arith.constant 0 : index
    %c0_2 = arith.constant 0 : index
    %1 = vector.load %arg3[%c0_1, %c0_2] : memref<16x1xf32, #tpu.memory_space<vmem>>, vector<16x1xf32>
    %2 = vector.broadcast %1 : vector<16x1xf32> to vector<16x128xf32>
    %3 = arith.subf %0, %2 : vector<16x128xf32>
    %c0_3 = arith.constant 0 : index
    %c0_4 = arith.constant 0 : index
    %4 = vector.load %arg4[%c0_3, %c0_4] : memref<16x128xf32, #tpu.memory_space<vmem>>, vector<16x128xf32>
    tpu.vector_store %arg4[%c0_3, %c0_4], %3 {strides = array<i32>} : memref<16x128xf32, #tpu.memory_space<vmem>>, vector<16x128xf32>,
    return
  }
  func.func @transform_0(%arg0: i32, %arg1: i32) -> (i32, i32) {
    %c0_i32 = arith.constant 0 : i32
    return %arg0, %arg1 : i32, i32
  }
  func.func @transform_1(%arg0: i32, %arg1: i32) -> (i32, i32) {
    %c0_i32 = arith.constant 0 : i32
    %c0_i32_0 = arith.constant 0 : i32
    return %arg0, %c0_i32 : i32, i32
  }
  func.func @transform_2(%arg0: i32, %arg1: i32) -> (i32, i32) {
    %c0_i32 = arith.constant 0 : i32
    return %arg0, %arg1 : i32, i32
  }
}

module attributes {stable_mosaic.version = 11 : i64} {
  func.func @_linear_lse_kernel(%arg0: i32, %arg1: i32, %arg2: memref<16x32xbf16, #tpu.memory_space<vmem>>, %arg3: memref<32x128xbf16, #tpu.memory_space<vmem>>, %arg4: memref<1x128xf32, #tpu.memory_space<vmem>>, %arg5: memref<16x128xf32, #tpu.memory_space<vmem>>, %arg6: memref<16x1xf32, #tpu.memory_space<vmem>>, %arg7: memref<16x1xf32, #tpu.memory_space<vmem>>, %arg8: memref<16x1xf32, #tpu.memory_space<vmem>>) attributes {dimension_semantics = [#tpu.dimension_semantics<parallel>, #tpu.dimension_semantics<arbitrary>], iteration_bounds = array<i64: 1, 1>, scalar_prefetch = 0 : i64, scratch_operands = 2 : i64, tpu.core_type = #tpu.core_type<tc>, window_params = [{transform_indices = @transform_0, window_bounds = array<i64: 16, 32>}, {transform_indices = @transform_1, window_bounds = array<i64: 32, 128>}, {transform_indices = @transform_2, window_bounds = array<i64: 1, 128>}, {transform_indices = @transform_3, window_bounds = array<i64: 16, 128>}, {transform_indices = @transform_4, window_bounds = array<i64: 16, 1>}]} {
    %c0_i32 = arith.constant 0 : i32
    %0 = arith.cmpi eq, %arg1, %c0_i32 : i32
    %1 = arith.extui %0 : i1 to i32
    %c0_i32_0 = arith.constant 0 : i32
    %2 = arith.cmpi ne, %1, %c0_i32_0 : i32
    scf.if %2 {
      %cst_20 = arith.constant 0xFF800000 : f32
      %29 = vector.broadcast %cst_20 : f32 to vector<16x1xf32>
      %c0_21 = arith.constant 0 : index
      %c0_22 = arith.constant 0 : index
      %30 = vector.load %arg7[%c0_21, %c0_22] : memref<16x1xf32, #tpu.memory_space<vmem>>, vector<16x1xf32>
      tpu.vector_store %arg7[%c0_21, %c0_22], %29 {strides = array<i32>} : memref<16x1xf32, #tpu.memory_space<vmem>>, vector<16x1xf32>,
      %cst_23 = arith.constant 0.000000e+00 : f32
      %31 = vector.broadcast %cst_23 : f32 to vector<16x1xf32>
      %c0_24 = arith.constant 0 : index
      %c0_25 = arith.constant 0 : index
      %32 = vector.load %arg8[%c0_24, %c0_25] : memref<16x1xf32, #tpu.memory_space<vmem>>, vector<16x1xf32>
      tpu.vector_store %arg8[%c0_24, %c0_25], %31 {strides = array<i32>} : memref<16x1xf32, #tpu.memory_space<vmem>>, vector<16x1xf32>,
    } else {
    }
    %c0 = arith.constant 0 : index
    %c0_1 = arith.constant 0 : index
    %3 = vector.load %arg2[%c0, %c0_1] : memref<16x32xbf16, #tpu.memory_space<vmem>>, vector<16x32xbf16>
    %c0_2 = arith.constant 0 : index
    %c0_3 = arith.constant 0 : index
    %4 = vector.load %arg3[%c0_2, %c0_3] : memref<32x128xbf16, #tpu.memory_space<vmem>>, vector<32x128xbf16>
    %cst = arith.constant dense<0.000000e+00> : vector<16x128xf32>
    %5 = tpu.matmul %3, %4, %cst {dimension_numbers = #tpu.dot_dimension_numbers<[1], [0], [0], [1], [0, 0, 1, 1], [], []>} : vector<16x32xbf16>, vector<32x128xbf16>, vector<16x128xf32> -> vector<16x128xf32>
    %c0_4 = arith.constant 0 : index
    %c0_5 = arith.constant 0 : index
    %6 = vector.load %arg4[%c0_4, %c0_5] : memref<1x128xf32, #tpu.memory_space<vmem>>, vector<1x128xf32>
    %7 = vector.broadcast %6 : vector<1x128xf32> to vector<16x128xf32>
    %8 = arith.addf %5, %7 : vector<16x128xf32>
    %c0_6 = arith.constant 0 : index
    %c0_7 = arith.constant 0 : index
    %9 = vector.load %arg5[%c0_6, %c0_7] : memref<16x128xf32, #tpu.memory_space<vmem>>, vector<16x128xf32>
    tpu.vector_store %arg5[%c0_6, %c0_7], %8 {strides = array<i32>} : memref<16x128xf32, #tpu.memory_space<vmem>>, vector<16x128xf32>,
    %c0_8 = arith.constant 0 : index
    %c0_9 = arith.constant 0 : index
    %10 = vector.load %arg7[%c0_8, %c0_9] : memref<16x1xf32, #tpu.memory_space<vmem>>, vector<16x1xf32>
    %cst_10 = arith.constant dense<0xFF800000> : vector<16xf32>
    %11 = vector.multi_reduction <maximumf>, %8, %cst_10 [1] : vector<16x128xf32> to vector<16xf32>
    %12 = vector.shape_cast %11 : vector<16xf32> to vector<16x1xf32>
    %13 = arith.maximumf %10, %12 : vector<16x1xf32>
    %c0_11 = arith.constant 0 : index
    %c0_12 = arith.constant 0 : index
    %14 = vector.load %arg8[%c0_11, %c0_12] : memref<16x1xf32, #tpu.memory_space<vmem>>, vector<16x1xf32>
    %15 = arith.subf %10, %13 : vector<16x1xf32>
    %16 = math.exp %15 : vector<16x1xf32>
    %17 = arith.mulf %14, %16 : vector<16x1xf32>
    %18 = vector.broadcast %13 : vector<16x1xf32> to vector<16x128xf32>
    %19 = arith.subf %8, %18 : vector<16x128xf32>
    %20 = math.exp %19 : vector<16x128xf32>
    %cst_13 = arith.constant dense<0.000000e+00> : vector<16xf32>
    %21 = vector.multi_reduction <add>, %20, %cst_13 [1] : vector<16x128xf32> to vector<16xf32>
    %22 = vector.shape_cast %21 : vector<16xf32> to vector<16x1xf32>
    %23 = arith.addf %17, %22 : vector<16x1xf32>
    %c0_14 = arith.constant 0 : index
    %c0_15 = arith.constant 0 : index
    %24 = vector.load %arg8[%c0_14, %c0_15] : memref<16x1xf32, #tpu.memory_space<vmem>>, vector<16x1xf32>
    tpu.vector_store %arg8[%c0_14, %c0_15], %23 {strides = array<i32>} : memref<16x1xf32, #tpu.memory_space<vmem>>, vector<16x1xf32>,
    %c0_16 = arith.constant 0 : index
    %c0_17 = arith.constant 0 : index
    %25 = vector.load %arg7[%c0_16, %c0_17] : memref<16x1xf32, #tpu.memory_space<vmem>>, vector<16x1xf32>
    tpu.vector_store %arg7[%c0_16, %c0_17], %13 {strides = array<i32>} : memref<16x1xf32, #tpu.memory_space<vmem>>, vector<16x1xf32>,
    %c0_i32_18 = arith.constant 0 : i32
    %26 = arith.cmpi eq, %arg1, %c0_i32_18 : i32
    %27 = arith.extui %26 : i1 to i32
    %c0_i32_19 = arith.constant 0 : i32
    %28 = arith.cmpi ne, %27, %c0_i32_19 : i32
    scf.if %28 {
      %c0_20 = arith.constant 0 : index
      %c0_21 = arith.constant 0 : index
      %29 = vector.load %arg7[%c0_20, %c0_21] : memref<16x1xf32, #tpu.memory_space<vmem>>, vector<16x1xf32>
      %c0_22 = arith.constant 0 : index
      %c0_23 = arith.constant 0 : index
      %30 = vector.load %arg8[%c0_22, %c0_23] : memref<16x1xf32, #tpu.memory_space<vmem>>, vector<16x1xf32>
      %31 = math.log %30 : vector<16x1xf32>
      %32 = arith.addf %29, %31 : vector<16x1xf32>
      %c0_24 = arith.constant 0 : index
      %c0_25 = arith.constant 0 : index
      %33 = vector.load %arg6[%c0_24, %c0_25] : memref<16x1xf32, #tpu.memory_space<vmem>>, vector<16x1xf32>
      tpu.vector_store %arg6[%c0_24, %c0_25], %32 {strides = array<i32>} : memref<16x1xf32, #tpu.memory_space<vmem>>, vector<16x1xf32>,
    } else {
    }
    return
  }
  func.func @transform_0(%arg0: i32, %arg1: i32) -> (i32, i32) {
    %c0_i32 = arith.constant 0 : i32
    %c0_i32_0 = arith.constant 0 : i32
    return %arg0, %c0_i32 : i32, i32
  }
  func.func @transform_1(%arg0: i32, %arg1: i32) -> (i32, i32) {
    %c0_i32 = arith.constant 0 : i32
    %c0_i32_0 = arith.constant 0 : i32
    return %c0_i32, %arg1 : i32, i32
  }
  func.func @transform_2(%arg0: i32, %arg1: i32) -> (i32, i32) {
    %c0_i32 = arith.constant 0 : i32
    %c0_i32_0 = arith.constant 0 : i32
    return %c0_i32, %arg1 : i32, i32
  }
  func.func @transform_3(%arg0: i32, %arg1: i32) -> (i32, i32) {
    %c0_i32 = arith.constant 0 : i32
    return %arg0, %arg1 : i32, i32
  }
  func.func @transform_4(%arg0: i32, %arg1: i32) -> (i32, i32) {
    %c0_i32 = arith.constant 0 : i32
    %c0_i32_0 = arith.constant 0 : i32
    return %arg0, %c0_i32 : i32, i32
  }
}

</mosaic_0001>

<bundles_post_ra>
// kernel: bert_add_pretrain_forward.3
= control target key start
LH: loop header
LB: loop body
LE: loop exit
PB: predicated region body
PF: predicated region fallthrough
CT: control target
= control target key end

     0   :  { %v35_v0 = vmov 0   ;;  %s69_s1 = inlined_call_operand.vmem [shape: f32[16,1], index: 1, kind: input, shape index: {}]   ;;  %s70_s0 = inlined_call_operand.vmem [shape: f32[16,128], index: 0, kind: input, shape index: {}, may-alias: {0,2}]   ;;  %s71_s2 = inlined_call_operand.vmem [shape: f32[16,128], index: 2, kind: output, shape index: {}, may-alias: {0,2}]  }
   0x1   :  { %34 = vset.pattern.permute.xlu0 %v35_v0  ;;  %v13_v1 = vld [vmem:[%s69_s1] sm:$0xff]  ;;  %v14_v2 = vld [vmem:[%s69_s1 + $0x8] sm:$0xff] }
   0x2   :  { %17 = vperm.xlu0 %34, %v13_v1   ;;  %v11_v3 = vld [vmem:[%s70_s0] sm:$0xff]  ;;  %v12_v6 = vld [vmem:[%s70_s0 + $0x8] sm:$0xff] }
   0x6   :  { %22 = vperm.xlu0 %34, %v14_v2  }
  0x81   :  { %v18_v4 = vpop.permute.xlu0 %17 }
  0x82   :  { %v25_v5 = vsub.f32 %v11_v3, %v18_v4 }
  0x84   :  { %27 = vst [vmem:[%s71_s2] sm:$0xff] %v25_v5 }
  0x85   :  { %v23_v7 = vpop.permute.xlu0 %22 }
  0x86   :  { %v26_v8 = vsub.f32 %v12_v6, %v23_v7 }
  0x88   :  { %28 = vst [vmem:[%s71_s2 + $0x8] sm:$0xff] %v26_v8 }

// kernel: bert_add_pretrain_forward.2
= control target key start
LH: loop header
LB: loop body
LE: loop exit
PB: predicated region body
PF: predicated region fallthrough
CT: control target
= control target key end

     0   :  { %v208_v0 = vmov 0.0   ;;  %vm209_vm0 = vmmov 0   ;;  %vm56_vm1 = vcmask 261120   ;;  %vm21_vm2 = vcmask 7168   ;;  %s271_s1 = inlined_call_operand.vmem [shape: bf16[32,128], index: 1, kind: input, shape index: {}]   ;;  %s272_s0 = inlined_call_operand.vmem [shape: bf16[16,32], index: 0, kind: input, shape index: {}]   ;;  %s273_s2 = inlined_call_operand.vmem [shape: f32[1,128], index: 2, kind: input, shape index: {}]   ;;  %s274_s3 = inlined_call_operand.vmem [shape: f32[16,128], index: 3, kind: output, shape index: {0}]   ;;  %s275_s4 = inlined_call_operand.vmem [shape: f32[16,1], index: 4, kind: output, shape index: {1}]  }
   0x1   :  { %179 = vmatprep.subr.bf16.mxu0 %v208_v0  ;;  %v193_v1 = vld [vmem:[%s271_s1] sm:$0xff]   ;;  %183 = vmatprep.mubr.msk.bf16.mxu0 %vm209_vm0, %v208_v0  ;;  %v194_v2 = vld [vmem:[%s271_s1 + $0x8] sm:$0xff]   ;;  %v210_v4 = vmov -inf   ;;  %24 = vst.msk [vmem:[#allocation3] sm:$0xff] %vm21_vm2, %v208_v0  ;;  %25 = vst.msk [vmem:[#allocation3 + $0x8] sm:$0xff] %vm21_vm2, %v208_v0  ;;  %v211_v12 = vmov 0  }
   0x2   :  { %180 = vmatpush3.bf16.msra.mxu0 %v193_v1  ;;  %v195_v3 = vld [vmem:[%s272_s0] sm:$0xff]   ;;  %22 = vst.msk [vmem:[#allocation2] sm:$0xff] %vm21_vm2, %v210_v4  ;;  %23 = vst.msk [vmem:[#allocation2 + $0x8] sm:$0xff] %vm21_vm2, %v210_v4  ;;  %191 = vset.pattern.permute.xlu1 %v211_v12 }
   0x3   :  { %181 = vmatprep.subr.bf16.mxu0 %v208_v0  ;;  %v171_v5 = vld [vmem:[%s273_s2] ss:$0 sm:$0xff]  ;;  %192 = vset.pattern.permute.xlu0 %v211_v12 }
   0x6   :  { %182 = vmatpush3.bf16.msra.mxu0 %v194_v2 }
   0x8   :  { %v111_v32 = vld [vmem:[#allocation3] sm:$0xff]  ;;  %v112_v36 = vld [vmem:[#allocation3 + $0x8] sm:$0xff] }
   0x9   :  { %184 = vmatmul.mubr.msk.bf16.vlgmr.msra.gmra.mrb[0].mxu0 %vm56_vm1, %v195_v3  ;;  %v103_v13 = vld [vmem:[#allocation2] sm:$0xff]  ;;  %v104_v16 = vld [vmem:[#allocation2 + $0x8] sm:$0xff] }
  0xdc   :  { %v94_v6 = vpop.f32.mrb[0].mxu0 }
  0xdd   :  { %v95_v7 = vadd.f32 %v171_v5, %v94_v6  ;;  %v185_v8 = vpop.f32.mrb[1].mxu0 }
  0xde   :  { %v97_v9 = vpop.f32.mrb[2].mxu0 }
  0xdf   :  { %101 = vst [vmem:[%s274_s3] sm:$0xff] %v95_v7  ;;  %v98_v10 = vadd.f32 %v171_v5, %v97_v9  ;;  %105 = vmax.xlane.f32.xlu0 %v95_v7  ;;  %v186_v11 = vpop.f32.mrb[3].mxu0 }
  0xe1   :  { %102 = vst [vmem:[%s274_s3 + $0x8] sm:$0xff] %v98_v10 }
  0xe3   :  { %107 = vmax.xlane.f32.xlu0 %v98_v10 }
 0x16c   :  { %v106_v14 = vpop.xlane.xlu0 %105 }
 0x16d   :  { %v109_v15 = vmax.f32 %v103_v13, %v106_v14 }
 0x16f   :  { %v113_v17 = vsub.f32 %v103_v13, %v109_v15  ;;  %146 = vst.msk [vmem:[#allocation2] sm:$0xff] %vm21_vm2, %v109_v15  ;;  %123 = vperm.xlu1 %191, %v109_v15  }
 0x170   :  { %v108_v18 = vpop.xlane.xlu0 %107 }
 0x171   :  { %v110_v19 = vmax.f32 %v104_v16, %v108_v18  ;;  %v115_v29 = vmul.f32 1.442695, %v113_v17 }
 0x173   :  { %v114_v20 = vsub.f32 %v104_v16, %v110_v19  ;;  %147 = vst.msk [vmem:[#allocation2 + $0x8] sm:$0xff] %vm21_vm2, %v110_v19  ;;  %128 = vperm.xlu1 %191, %v110_v19  }
 0x175   :  { %v117_v30 = vmul.f32 1.442695, %v114_v20 }
 0x176   :  { %v151_v45 = vld [vmem:[#allocation2] sm:$0xff] }
 0x17a   :  { %v152_v49 = vld [vmem:[#allocation2 + $0x8] sm:$0xff] }
 0x1ee   :  { %v124_v21 = vpop.permute.xlu1 %123 }
 0x1ef   :  { %v131_v22 = vsub.f32 %v95_v7, %v124_v21 }
 0x1f1   :  { %v133_v23 = vmul.f32 1.442695, %v131_v22 }
 0x1f2   :  { %v129_v24 = vpop.permute.xlu1 %128 }
 0x1f3   :  { %196 = vpow2.f32 %v133_v23  ;;  %v132_v25 = vsub.f32 %v98_v10, %v129_v24 }
 0x1f5   :  { %v135_v26 = vmul.f32 1.442695, %v132_v25 }
 0x1f7   :  { %198 = vpow2.f32 %v135_v26 }
 0x1f8   :  { %200 = vpow2.f32 %v115_v29 }
 0x1f9   :  { %202 = vpow2.f32 %v117_v30 }
 0x1fd   :  { %v197_v27 = vpop.eup %196 }
 0x1fe   :  { %137 = vadd.xlane.f32.xlu0 %v197_v27 }
 0x201   :  { %v199_v28 = vpop.eup %198 }
 0x202   :  { %139 = vadd.xlane.f32.xlu1 %v199_v28  ;;  %v201_v31 = vpop.eup %200 }
 0x203   :  { %v119_v33 = vmul.f32 %v201_v31, %v111_v32  ;;  %v203_v34 = vpop.eup %202 }
 0x204   :  { %v120_v38 = vmul.f32 %v203_v34, %v112_v36 }
 0x28b   :  { %v138_v35 = vpop.xlane.xlu0 %137 }
 0x28c   :  { %v141_v37 = vadd.f32 %v138_v35, %v119_v33 }
 0x28e   :  { %144 = vst.msk [vmem:[#allocation3] sm:$0xff] %vm21_vm2, %v141_v37 }
 0x28f   :  { %v140_v39 = vpop.xlane.xlu1 %139 }
 0x290   :  { %v142_v40 = vadd.f32 %v140_v39, %v120_v38 }
 0x292   :  { %145 = vst.msk [vmem:[#allocation3 + $0x8] sm:$0xff] %vm21_vm2, %v142_v40 }
 0x295   :  { %v153_v41 = vld [vmem:[#allocation3] sm:$0xff] }
 0x296   :  { %204 = vlog2.f32 %v153_v41 }
 0x299   :  { %v154_v42 = vld [vmem:[#allocation3 + $0x8] sm:$0xff] }
 0x29a   :  { %206 = vlog2.f32 %v154_v42 }
 0x2a0   :  { %v205_v43 = vpop.eup %204 }
 0x2a1   :  { %v156_v44 = vmul.f32 0.6931472, %v205_v43 }
 0x2a3   :  { %v159_v46 = vadd.f32 %v156_v44, %v151_v45 }
 0x2a4   :  { %v207_v47 = vpop.eup %206 }
 0x2a5   :  { %161 = vst.msk [vmem:[%s275_s4] sm:$0xff] %vm21_vm2, %v159_v46  ;;  %v158_v48 = vmul.f32 0.6931472, %v207_v47 }
 0x2a7   :  { %v160_v50 = vadd.f32 %v158_v48, %v152_v49 }
 0x2a9   :  { %162 = vst.msk [vmem:[%s275_s4 + $0x8] sm:$0xff] %vm21_vm2, %v160_v50 }

</bundles_post_ra>
